<compile_context>
chip_gen: v7x
topology: tpu7x:2x2x1
jax: 0.10.0
libtpu: 0.0.40
codegen_flags: <defaults>
</compile_context>

<pallas_src>
import jax
import jax.numpy as jnp
from jax.experimental import pallas as pl
from jax.experimental.pallas import tpu as pltpu

EMBED_DIM = 16
SEQ_LEN = 8
BATCH = 2

# enc_dict exactly in the shape the PyTorch module expects.
ENC_DICT = {
    "user_id": {"vocab_size": 100, "type": "user"},
    "item_target_id": {"vocab_size": 50, "type": "item"},
    "item_target_category": {"vocab_size": 20, "type": "item"},
    "history_item_id": {"share_with": "item_target_id"},
    "history_category": {"share_with": "item_target_category"},
}
USER_COLS = ["user_id"]
ITEM_COLS = ["item_target_id", "item_target_category"]
HIST_COLS = ["history_item_id", "history_category"]          # share_with ITEM_COLS

DE = EMBED_DIM * len(ITEM_COLS)          # 32  item_emb / per-timestep history width
USER_W = EMBED_DIM * len(USER_COLS)      # 16  user_emb width
HIST_W = SEQ_LEN * DE                    # 256 flattened history width
PACK_RAW = USER_W + DE + HIST_W          # 304 live lanes
PACK_W = ((PACK_RAW + 127) // 128) * 128 # 384 lane-dense output width
PACK_PAD = PACK_W - PACK_RAW             # 80  zero-padded lanes


def _vocab(col):
    c = ENC_DICT[col]
    return ENC_DICT[c["share_with"]]["vocab_size"] if "share_with" in c else c["vocab_size"]


# ---------------------------------------------------------------------------
# Kernel: in-VMEM row gather + packed lane-dense output slab
# ---------------------------------------------------------------------------
def _build_embedding_kernel(tb, L):
    def kernel(uid_ref, iid_ref, icat_ref, hid_ref, hcat_ref,    # scalar prefetch (SMEM, 1-D int32)
               user_tbl, itemid_tbl, itemcat_tbl,                # embedding tables (VMEM-resident)
               out_ref):                                         # (tb, PACK_W) packed output block
        base = pl.program_id(0) * tb

        # Zero the whole block once (covers the PACK_PAD lanes); live lanes are
        # overwritten below.  The HBM writeback is one (tb, 384) slab.
        out_ref[...] = jnp.zeros_like(out_ref)

        for b in range(tb):
            g = base + b                                          # global batch row

            def put(col, row, _b=b):
                out_ref[pl.ds(_b, 1), pl.ds(col, EMBED_DIM)] = row

            # user / item embeddings: dynamic-sublane row loads from VMEM tables
            put(0, user_tbl[pl.ds(uid_ref[g], 1), :])
            put(USER_W, itemid_tbl[pl.ds(iid_ref[g], 1), :])
            put(USER_W + EMBED_DIM, itemcat_tbl[pl.ds(icat_ref[g], 1), :])

            # history embeddings (share item tables); flat id index = g * L + t
            for t in range(L):
                h = g * L + t
                col = USER_W + DE + t * DE
                put(col, itemid_tbl[pl.ds(hid_ref[h], 1), :])
                put(col + EMBED_DIM, itemcat_tbl[pl.ds(hcat_ref[h], 1), :])

    return kernel


# ---------------------------------------------------------------------------
# Wrapper: mirrors EmbeddingLayer.forward -> (user_emb, item_emb, history_seq)
# ---------------------------------------------------------------------------
def embedding_layer_forward(tables, data, *, batch_tile=None):
    B, L = data["history_item_id"].shape
    tb = B if batch_tile is None else batch_tile
    assert B % tb == 0
    # NOTE: if tb < B, tb must be a multiple of 8 (f32 sublane tile) per the
    # (8, 128) BlockSpec rule; at the demo scale tb == B (full-array block).

    def ids(col):
        v = _vocab(col)
        # clamp so an out-of-range id can never index past the VMEM table
        return jnp.clip(data[col].astype(jnp.int32), 0, v - 1).reshape(-1)

    uid = ids("user_id")                    # (B,)
    iid = ids("item_target_id")             # (B,)
    icat = ids("item_target_category")      # (B,)
    hid = ids("history_item_id")            # (B*L,) flat 1-D -> no 2-D SMEM padding
    hcat = ids("history_category")          # (B*L,)

    vmem = pl.BlockSpec(memory_space=pltpu.MemorySpace.VMEM)
    grid_spec = pltpu.PrefetchScalarGridSpec(
        num_scalar_prefetch=5,
        grid=(B // tb,),
        in_specs=[vmem, vmem, vmem],        # whole tables VMEM-resident (~11 KB total)
        out_specs=pl.BlockSpec((tb, PACK_W),
                               lambda i, uid, iid, icat, hid, hcat: (i, 0)),
    )
    packed = pl.pallas_call(
        _build_embedding_kernel(tb, L),
        out_shape=jax.ShapeDtypeStruct((B, PACK_W), jnp.float32),
        grid_spec=grid_spec,
        compiler_params=pltpu.CompilerParams(
            dimension_semantics=("parallel",),     # batch blocks may split across v7x's 2 TCs
            vmem_limit_bytes=32 * 1024 * 1024),
    )(uid, iid, icat, hid, hcat,
      tables["user_id"], tables["item_target_id"], tables["item_target_category"])

    # Unpack the lane-dense slab into the module's three outputs (cheap XLA slices).
    user_emb = packed[:, :USER_W]
    item_emb = packed[:, USER_W:USER_W + DE]
    history_seq = packed[:, USER_W + DE:PACK_RAW].reshape(B, L, DE)
    return user_emb, item_emb, history_seq


# Pure-JAX reference of EmbeddingLayer.forward for verification.
def embedding_layer_ref(tables, data):
    user = tables["user_id"][data["user_id"]]
    item = jnp.concatenate([tables["item_target_id"][data["item_target_id"]],
                            tables["item_target_category"][data["item_target_category"]]],
                           axis=-1)
    hist = jnp.concatenate([tables["item_target_id"][data["history_item_id"]],
                            tables["item_target_category"][data["history_category"]]],
                           axis=-1)
    return user, item, hist


# ---------------------------------------------------------------------------
if __name__ == "__main__":
    key = jax.random.PRNGKey(0)
    kt, kd = jax.random.split(key)
    tks = jax.random.split(kt, 3)

    def emb_table(k, vocab_size):
        t = jax.random.normal(k, (vocab_size, EMBED_DIM), jnp.float32) * 0.1
        return t.at[0].set(0.0)                         # nn.Embedding(padding_idx=0)

    tables = {
        "user_id": emb_table(tks[0], _vocab("user_id")),
        "item_target_id": emb_table(tks[1], _vocab("item_target_id")),
        "item_target_category": emb_table(tks[2], _vocab("item_target_category")),
    }

    dks = jax.random.split(kd, 5)
    data = {
        "user_id": jax.random.randint(dks[0], (BATCH,), 1, _vocab("user_id")),
        "item_target_id": jax.random.randint(dks[1], (BATCH,), 1, _vocab("item_target_id")),
        "item_target_category": jax.random.randint(dks[2], (BATCH,), 1, _vocab("item_target_category")),
        "history_item_id": jax.random.randint(dks[3], (BATCH, SEQ_LEN), 1, _vocab("history_item_id")),
        "history_category": jax.random.randint(dks[4], (BATCH, SEQ_LEN), 1, _vocab("history_category")),
    }
    # zero-pad history tails (padding_idx=0 rows) so the padding path is exercised
    pad = jnp.arange(SEQ_LEN)[None, :] >= jnp.array([[6], [5]])
    data["history_item_id"] = jnp.where(pad, 0, data["history_item_id"])
    data["history_category"] = jnp.where(pad, 0, data["history_category"])

    user_emb, item_emb, history_seq = jax.block_until_ready(
        embedding_layer_forward(tables, data))

    assert user_emb.shape == (BATCH, USER_W)
    assert item_emb.shape == (BATCH, DE)
    assert history_seq.shape == (BATCH, SEQ_LEN, DE)

    ref_user, ref_item, ref_hist = embedding_layer_ref(tables, data)
    assert bool(jnp.allclose(user_emb, ref_user, atol=1e-6))
    assert bool(jnp.allclose(item_emb, ref_item, atol=1e-6))
    assert bool(jnp.allclose(history_seq, ref_hist, atol=1e-6))
    # padding_idx=0 history rows must come back exactly zero
    assert bool(jnp.all(history_seq[0, 6:] == 0.0)) and bool(jnp.all(history_seq[1, 5:] == 0.0))

    print("KERNEL_OK")
</pallas_src>

<mosaic_0001>
module attributes {stable_mosaic.version = 11 : i64} {
  func.func @kernel(%arg0: i32, %arg1: memref<2xi32, #tpu.memory_space<smem>>, %arg2: memref<2xi32, #tpu.memory_space<smem>>, %arg3: memref<2xi32, #tpu.memory_space<smem>>, %arg4: memref<16xi32, #tpu.memory_space<smem>>, %arg5: memref<16xi32, #tpu.memory_space<smem>>, %arg6: memref<100x16xf32, #tpu.memory_space<vmem>>, %arg7: memref<50x16xf32, #tpu.memory_space<vmem>>, %arg8: memref<20x16xf32, #tpu.memory_space<vmem>>, %arg9: memref<2x384xf32, #tpu.memory_space<vmem>>) attributes {dimension_semantics = [#tpu.dimension_semantics<parallel>], iteration_bounds = array<i64: 1>, scalar_prefetch = 5 : i64, scratch_operands = 0 : i64, tpu.core_type = #tpu.core_type<tc>, window_params = [{pipeline_mode = #tpu.pipeline_mode<synchronous>, transform_indices = @transform_0, window_bounds = array<i64: 100, 16>}, {pipeline_mode = #tpu.pipeline_mode<synchronous>, transform_indices = @transform_1, window_bounds = array<i64: 50, 16>}, {pipeline_mode = #tpu.pipeline_mode<synchronous>, transform_indices = @transform_2, window_bounds = array<i64: 20, 16>}, {transform_indices = @transform_3, window_bounds = array<i64: 2, 384>}]} {
    %c2_i32 = arith.constant 2 : i32
    %0 = arith.muli %arg0, %c2_i32 : i32
    %cst = arith.constant 0.000000e+00 : f32
    %1 = vector.broadcast %cst : f32 to vector<2x384xf32>
    %c0 = arith.constant 0 : index
    %c0_0 = arith.constant 0 : index
    %2 = vector.load %arg9[%c0, %c0_0] : memref<2x384xf32, #tpu.memory_space<vmem>>, vector<2x384xf32>
    tpu.vector_store %arg9[%c0, %c0_0], %1 {strides = array<i32>} : memref<2x384xf32, #tpu.memory_space<vmem>>, vector<2x384xf32>,
    %c0_i32 = arith.constant 0 : i32
    %3 = arith.addi %0, %c0_i32 : i32
    %4 = arith.index_cast %3 : i32 to index
    %5 = memref.load %arg1[%4] : memref<2xi32, #tpu.memory_space<smem>>
    %6 = arith.index_cast %5 : i32 to index
    %c0_1 = arith.constant 0 : index
    %7 = vector.load %arg6[%6, %c0_1] : memref<100x16xf32, #tpu.memory_space<vmem>>, vector<1x16xf32>
    %c0_2 = arith.constant 0 : index
    %c0_3 = arith.constant 0 : index
    %8 = vector.load %arg9[%c0_2, %c0_3] : memref<2x384xf32, #tpu.memory_space<vmem>>, vector<1x16xf32>
    tpu.vector_store %arg9[%c0_2, %c0_3], %7 {strides = array<i32>} : memref<2x384xf32, #tpu.memory_space<vmem>>, vector<1x16xf32>,
    %9 = arith.index_cast %3 : i32 to index
    %10 = memref.load %arg2[%9] : memref<2xi32, #tpu.memory_space<smem>>
    %11 = arith.index_cast %10 : i32 to index
    %c0_4 = arith.constant 0 : index
    %12 = vector.load %arg7[%11, %c0_4] : memref<50x16xf32, #tpu.memory_space<vmem>>, vector<1x16xf32>
    %c0_5 = arith.constant 0 : index
    %c16 = arith.constant 16 : index
    %13 = vector.load %arg9[%c0_5, %c16] : memref<2x384xf32, #tpu.memory_space<vmem>>, vector<1x16xf32>
    tpu.vector_store %arg9[%c0_5, %c16], %12 {strides = array<i32>} : memref<2x384xf32, #tpu.memory_space<vmem>>, vector<1x16xf32>,
    %14 = arith.index_cast %3 : i32 to index
    %15 = memref.load %arg3[%14] : memref<2xi32, #tpu.memory_space<smem>>
    %16 = arith.index_cast %15 : i32 to index
    %c0_6 = arith.constant 0 : index
    %17 = vector.load %arg8[%16, %c0_6] : memref<20x16xf32, #tpu.memory_space<vmem>>, vector<1x16xf32>
    %c0_7 = arith.constant 0 : index
    %c32 = arith.constant 32 : index
    %18 = vector.load %arg9[%c0_7, %c32] : memref<2x384xf32, #tpu.memory_space<vmem>>, vector<1x16xf32>
    tpu.vector_store %arg9[%c0_7, %c32], %17 {strides = array<i32>} : memref<2x384xf32, #tpu.memory_space<vmem>>, vector<1x16xf32>,
    %c8_i32 = arith.constant 8 : i32
    %19 = arith.muli %3, %c8_i32 : i32
    %c0_i32_8 = arith.constant 0 : i32
    %20 = arith.addi %19, %c0_i32_8 : i32
    %21 = arith.index_cast %20 : i32 to index
    %22 = memref.load %arg4[%21] : memref<16xi32, #tpu.memory_space<smem>>
    %23 = arith.index_cast %22 : i32 to index
    %c0_9 = arith.constant 0 : index
    %24 = vector.load %arg7[%23, %c0_9] : memref<50x16xf32, #tpu.memory_space<vmem>>, vector<1x16xf32>
    %c0_10 = arith.constant 0 : index
    %c48 = arith.constant 48 : index
    %25 = vector.load %arg9[%c0_10, %c48] : memref<2x384xf32, #tpu.memory_space<vmem>>, vector<1x16xf32>
    tpu.vector_store %arg9[%c0_10, %c48], %24 {strides = array<i32>} : memref<2x384xf32, #tpu.memory_space<vmem>>, vector<1x16xf32>,
    %26 = arith.index_cast %20 : i32 to index
    %27 = memref.load %arg5[%26] : memref<16xi32, #tpu.memory_space<smem>>
    %28 = arith.index_cast %27 : i32 to index
    %c0_11 = arith.constant 0 : index
    %29 = vector.load %arg8[%28, %c0_11] : memref<20x16xf32, #tpu.memory_space<vmem>>, vector<1x16xf32>
    %c0_12 = arith.constant 0 : index
    %c64 = arith.constant 64 : index
    %30 = vector.load %arg9[%c0_12, %c64] : memref<2x384xf32, #tpu.memory_space<vmem>>, vector<1x16xf32>
    tpu.vector_store %arg9[%c0_12, %c64], %29 {strides = array<i32>} : memref<2x384xf32, #tpu.memory_space<vmem>>, vector<1x16xf32>,
    %c8_i32_13 = arith.constant 8 : i32
    %31 = arith.muli %3, %c8_i32_13 : i32
    %c1_i32 = arith.constant 1 : i32
    %32 = arith.addi %31, %c1_i32 : i32
    %33 = arith.index_cast %32 : i32 to index
    %34 = memref.load %arg4[%33] : memref<16xi32, #tpu.memory_space<smem>>
    %35 = arith.index_cast %34 : i32 to index
    %c0_14 = arith.constant 0 : index
    %36 = vector.load %arg7[%35, %c0_14] : memref<50x16xf32, #tpu.memory_space<vmem>>, vector<1x16xf32>
    %c0_15 = arith.constant 0 : index
    %c80 = arith.constant 80 : index
    %37 = vector.load %arg9[%c0_15, %c80] : memref<2x384xf32, #tpu.memory_space<vmem>>, vector<1x16xf32>
    tpu.vector_store %arg9[%c0_15, %c80], %36 {strides = array<i32>} : memref<2x384xf32, #tpu.memory_space<vmem>>, vector<1x16xf32>,
    %38 = arith.index_cast %32 : i32 to index
    %39 = memref.load %arg5[%38] : memref<16xi32, #tpu.memory_space<smem>>
    %40 = arith.index_cast %39 : i32 to index
    %c0_16 = arith.constant 0 : index
    %41 = vector.load %arg8[%40, %c0_16] : memref<20x16xf32, #tpu.memory_space<vmem>>, vector<1x16xf32>
    %c0_17 = arith.constant 0 : index
    %c96 = arith.constant 96 : index
    %42 = vector.load %arg9[%c0_17, %c96] : memref<2x384xf32, #tpu.memory_space<vmem>>, vector<1x16xf32>
    tpu.vector_store %arg9[%c0_17, %c96], %41 {strides = array<i32>} : memref<2x384xf32, #tpu.memory_space<vmem>>, vector<1x16xf32>,
    %c8_i32_18 = arith.constant 8 : i32
    %43 = arith.muli %3, %c8_i32_18 : i32
    %c2_i32_19 = arith.constant 2 : i32
    %44 = arith.addi %43, %c2_i32_19 : i32
    %45 = arith.index_cast %44 : i32 to index
    %46 = memref.load %arg4[%45] : memref<16xi32, #tpu.memory_space<smem>>
    %47 = arith.index_cast %46 : i32 to index
    %c0_20 = arith.constant 0 : index
    %48 = vector.load %arg7[%47, %c0_20] : memref<50x16xf32, #tpu.memory_space<vmem>>, vector<1x16xf32>
    %c0_21 = arith.constant 0 : index
    %c112 = arith.constant 112 : index
    %49 = vector.load %arg9[%c0_21, %c112] : memref<2x384xf32, #tpu.memory_space<vmem>>, vector<1x16xf32>
    tpu.vector_store %arg9[%c0_21, %c112], %48 {strides = array<i32>} : memref<2x384xf32, #tpu.memory_space<vmem>>, vector<1x16xf32>,
    %50 = arith.index_cast %44 : i32 to index
    %51 = memref.load %arg5[%50] : memref<16xi32, #tpu.memory_space<smem>>
    %52 = arith.index_cast %51 : i32 to index
    %c0_22 = arith.constant 0 : index
    %53 = vector.load %arg8[%52, %c0_22] : memref<20x16xf32, #tpu.memory_space<vmem>>, vector<1x16xf32>
    %c0_23 = arith.constant 0 : index
    %c128 = arith.constant 128 : index
    %54 = vector.load %arg9[%c0_23, %c128] : memref<2x384xf32, #tpu.memory_space<vmem>>, vector<1x16xf32>
    tpu.vector_store %arg9[%c0_23, %c128], %53 {strides = array<i32>} : memref<2x384xf32, #tpu.memory_space<vmem>>, vector<1x16xf32>,
    %c8_i32_24 = arith.constant 8 : i32
    %55 = arith.muli %3, %c8_i32_24 : i32
    %c3_i32 = arith.constant 3 : i32
    %56 = arith.addi %55, %c3_i32 : i32
    %57 = arith.index_cast %56 : i32 to index
    %58 = memref.load %arg4[%57] : memref<16xi32, #tpu.memory_space<smem>>
    %59 = arith.index_cast %58 : i32 to index
    %c0_25 = arith.constant 0 : index
    %60 = vector.load %arg7[%59, %c0_25] : memref<50x16xf32, #tpu.memory_space<vmem>>, vector<1x16xf32>
    %c0_26 = arith.constant 0 : index
    %c144 = arith.constant 144 : index
    %61 = vector.load %arg9[%c0_26, %c144] : memref<2x384xf32, #tpu.memory_space<vmem>>, vector<1x16xf32>
    tpu.vector_store %arg9[%c0_26, %c144], %60 {strides = array<i32>} : memref<2x384xf32, #tpu.memory_space<vmem>>, vector<1x16xf32>,
    %62 = arith.index_cast %56 : i32 to index
    %63 = memref.load %arg5[%62] : memref<16xi32, #tpu.memory_space<smem>>
    %64 = arith.index_cast %63 : i32 to index
    %c0_27 = arith.constant 0 : index
    %65 = vector.load %arg8[%64, %c0_27] : memref<20x16xf32, #tpu.memory_space<vmem>>, vector<1x16xf32>
    %c0_28 = arith.constant 0 : index
    %c160 = arith.constant 160 : index
    %66 = vector.load %arg9[%c0_28, %c160] : memref<2x384xf32, #tpu.memory_space<vmem>>, vector<1x16xf32>
    tpu.vector_store %arg9[%c0_28, %c160], %65 {strides = array<i32>} : memref<2x384xf32, #tpu.memory_space<vmem>>, vector<1x16xf32>,
    %c8_i32_29 = arith.constant 8 : i32
    %67 = arith.muli %3, %c8_i32_29 : i32
    %c4_i32 = arith.constant 4 : i32
    %68 = arith.addi %67, %c4_i32 : i32
    %69 = arith.index_cast %68 : i32 to index
    %70 = memref.load %arg4[%69] : memref<16xi32, #tpu.memory_space<smem>>
    %71 = arith.index_cast %70 : i32 to index
    %c0_30 = arith.constant 0 : index
    %72 = vector.load %arg7[%71, %c0_30] : memref<50x16xf32, #tpu.memory_space<vmem>>, vector<1x16xf32>
    %c0_31 = arith.constant 0 : index
    %c176 = arith.constant 176 : index
    %73 = vector.load %arg9[%c0_31, %c176] : memref<2x384xf32, #tpu.memory_space<vmem>>, vector<1x16xf32>
    tpu.vector_store %arg9[%c0_31, %c176], %72 {strides = array<i32>} : memref<2x384xf32, #tpu.memory_space<vmem>>, vector<1x16xf32>,
    %74 = arith.index_cast %68 : i32 to index
    %75 = memref.load %arg5[%74] : memref<16xi32, #tpu.memory_space<smem>>
    %76 = arith.index_cast %75 : i32 to index
    %c0_32 = arith.constant 0 : index
    %77 = vector.load %arg8[%76, %c0_32] : memref<20x16xf32, #tpu.memory_space<vmem>>, vector<1x16xf32>
    %c0_33 = arith.constant 0 : index
    %c192 = arith.constant 192 : index
    %78 = vector.load %arg9[%c0_33, %c192] : memref<2x384xf32, #tpu.memory_space<vmem>>, vector<1x16xf32>
    tpu.vector_store %arg9[%c0_33, %c192], %77 {strides = array<i32>} : memref<2x384xf32, #tpu.memory_space<vmem>>, vector<1x16xf32>,
    %c8_i32_34 = arith.constant 8 : i32
    %79 = arith.muli %3, %c8_i32_34 : i32
    %c5_i32 = arith.constant 5 : i32
    %80 = arith.addi %79, %c5_i32 : i32
    %81 = arith.index_cast %80 : i32 to index
    %82 = memref.load %arg4[%81] : memref<16xi32, #tpu.memory_space<smem>>
    %83 = arith.index_cast %82 : i32 to index
    %c0_35 = arith.constant 0 : index
    %84 = vector.load %arg7[%83, %c0_35] : memref<50x16xf32, #tpu.memory_space<vmem>>, vector<1x16xf32>
    %c0_36 = arith.constant 0 : index
    %c208 = arith.constant 208 : index
    %85 = vector.load %arg9[%c0_36, %c208] : memref<2x384xf32, #tpu.memory_space<vmem>>, vector<1x16xf32>
    tpu.vector_store %arg9[%c0_36, %c208], %84 {strides = array<i32>} : memref<2x384xf32, #tpu.memory_space<vmem>>, vector<1x16xf32>,
    %86 = arith.index_cast %80 : i32 to index
    %87 = memref.load %arg5[%86] : memref<16xi32, #tpu.memory_space<smem>>
    %88 = arith.index_cast %87 : i32 to index
    %c0_37 = arith.constant 0 : index
    %89 = vector.load %arg8[%88, %c0_37] : memref<20x16xf32, #tpu.memory_space<vmem>>, vector<1x16xf32>
    %c0_38 = arith.constant 0 : index
    %c224 = arith.constant 224 : index
    %90 = vector.load %arg9[%c0_38, %c224] : memref<2x384xf32, #tpu.memory_space<vmem>>, vector<1x16xf32>
    tpu.vector_store %arg9[%c0_38, %c224], %89 {strides = array<i32>} : memref<2x384xf32, #tpu.memory_space<vmem>>, vector<1x16xf32>,
    %c8_i32_39 = arith.constant 8 : i32
    %91 = arith.muli %3, %c8_i32_39 : i32
    %c6_i32 = arith.constant 6 : i32
    %92 = arith.addi %91, %c6_i32 : i32
    %93 = arith.index_cast %92 : i32 to index
    %94 = memref.load %arg4[%93] : memref<16xi32, #tpu.memory_space<smem>>
    %95 = arith.index_cast %94 : i32 to index
    %c0_40 = arith.constant 0 : index
    %96 = vector.load %arg7[%95, %c0_40] : memref<50x16xf32, #tpu.memory_space<vmem>>, vector<1x16xf32>
    %c0_41 = arith.constant 0 : index
    %c240 = arith.constant 240 : index
    %97 = vector.load %arg9[%c0_41, %c240] : memref<2x384xf32, #tpu.memory_space<vmem>>, vector<1x16xf32>
    tpu.vector_store %arg9[%c0_41, %c240], %96 {strides = array<i32>} : memref<2x384xf32, #tpu.memory_space<vmem>>, vector<1x16xf32>,
    %98 = arith.index_cast %92 : i32 to index
    %99 = memref.load %arg5[%98] : memref<16xi32, #tpu.memory_space<smem>>
    %100 = arith.index_cast %99 : i32 to index
    %c0_42 = arith.constant 0 : index
    %101 = vector.load %arg8[%100, %c0_42] : memref<20x16xf32, #tpu.memory_space<vmem>>, vector<1x16xf32>
    %c0_43 = arith.constant 0 : index
    %c256 = arith.constant 256 : index
    %102 = vector.load %arg9[%c0_43, %c256] : memref<2x384xf32, #tpu.memory_space<vmem>>, vector<1x16xf32>
    tpu.vector_store %arg9[%c0_43, %c256], %101 {strides = array<i32>} : memref<2x384xf32, #tpu.memory_space<vmem>>, vector<1x16xf32>,
    %c8_i32_44 = arith.constant 8 : i32
    %103 = arith.muli %3, %c8_i32_44 : i32
    %c7_i32 = arith.constant 7 : i32
    %104 = arith.addi %103, %c7_i32 : i32
    %105 = arith.index_cast %104 : i32 to index
    %106 = memref.load %arg4[%105] : memref<16xi32, #tpu.memory_space<smem>>
    %107 = arith.index_cast %106 : i32 to index
    %c0_45 = arith.constant 0 : index
    %108 = vector.load %arg7[%107, %c0_45] : memref<50x16xf32, #tpu.memory_space<vmem>>, vector<1x16xf32>
    %c0_46 = arith.constant 0 : index
    %c272 = arith.constant 272 : index
    %109 = vector.load %arg9[%c0_46, %c272] : memref<2x384xf32, #tpu.memory_space<vmem>>, vector<1x16xf32>
    tpu.vector_store %arg9[%c0_46, %c272], %108 {strides = array<i32>} : memref<2x384xf32, #tpu.memory_space<vmem>>, vector<1x16xf32>,
    %110 = arith.index_cast %104 : i32 to index
    %111 = memref.load %arg5[%110] : memref<16xi32, #tpu.memory_space<smem>>
    %112 = arith.index_cast %111 : i32 to index
    %c0_47 = arith.constant 0 : index
    %113 = vector.load %arg8[%112, %c0_47] : memref<20x16xf32, #tpu.memory_space<vmem>>, vector<1x16xf32>
    %c0_48 = arith.constant 0 : index
    %c288 = arith.constant 288 : index
    %114 = vector.load %arg9[%c0_48, %c288] : memref<2x384xf32, #tpu.memory_space<vmem>>, vector<1x16xf32>
    tpu.vector_store %arg9[%c0_48, %c288], %113 {strides = array<i32>} : memref<2x384xf32, #tpu.memory_space<vmem>>, vector<1x16xf32>,
    %c1_i32_49 = arith.constant 1 : i32
    %115 = arith.addi %0, %c1_i32_49 : i32
    %116 = arith.index_cast %115 : i32 to index
    %117 = memref.load %arg1[%116] : memref<2xi32, #tpu.memory_space<smem>>
    %118 = arith.index_cast %117 : i32 to index
    %c0_50 = arith.constant 0 : index
    %119 = vector.load %arg6[%118, %c0_50] : memref<100x16xf32, #tpu.memory_space<vmem>>, vector<1x16xf32>
    %c1 = arith.constant 1 : index
    %c0_51 = arith.constant 0 : index
    %120 = vector.load %arg9[%c1, %c0_51] : memref<2x384xf32, #tpu.memory_space<vmem>>, vector<1x16xf32>
    tpu.vector_store %arg9[%c1, %c0_51], %119 {strides = array<i32>} : memref<2x384xf32, #tpu.memory_space<vmem>>, vector<1x16xf32>,
    %121 = arith.index_cast %115 : i32 to index
    %122 = memref.load %arg2[%121] : memref<2xi32, #tpu.memory_space<smem>>
    %123 = arith.index_cast %122 : i32 to index
    %c0_52 = arith.constant 0 : index
    %124 = vector.load %arg7[%123, %c0_52] : memref<50x16xf32, #tpu.memory_space<vmem>>, vector<1x16xf32>
    %c1_53 = arith.constant 1 : index
    %c16_54 = arith.constant 16 : index
    %125 = vector.load %arg9[%c1_53, %c16_54] : memref<2x384xf32, #tpu.memory_space<vmem>>, vector<1x16xf32>
    tpu.vector_store %arg9[%c1_53, %c16_54], %124 {strides = array<i32>} : memref<2x384xf32, #tpu.memory_space<vmem>>, vector<1x16xf32>,
    %126 = arith.index_cast %115 : i32 to index
    %127 = memref.load %arg3[%126] : memref<2xi32, #tpu.memory_space<smem>>
    %128 = arith.index_cast %127 : i32 to index
    %c0_55 = arith.constant 0 : index
    %129 = vector.load %arg8[%128, %c0_55] : memref<20x16xf32, #tpu.memory_space<vmem>>, vector<1x16xf32>
    %c1_56 = arith.constant 1 : index
    %c32_57 = arith.constant 32 : index
    %130 = vector.load %arg9[%c1_56, %c32_57] : memref<2x384xf32, #tpu.memory_space<vmem>>, vector<1x16xf32>
    tpu.vector_store %arg9[%c1_56, %c32_57], %129 {strides = array<i32>} : memref<2x384xf32, #tpu.memory_space<vmem>>, vector<1x16xf32>,
    %c8_i32_58 = arith.constant 8 : i32
    %131 = arith.muli %115, %c8_i32_58 : i32
    %c0_i32_59 = arith.constant 0 : i32
    %132 = arith.addi %131, %c0_i32_59 : i32
    %133 = arith.index_cast %132 : i32 to index
    %134 = memref.load %arg4[%133] : memref<16xi32, #tpu.memory_space<smem>>
    %135 = arith.index_cast %134 : i32 to index
    %c0_60 = arith.constant 0 : index
    %136 = vector.load %arg7[%135, %c0_60] : memref<50x16xf32, #tpu.memory_space<vmem>>, vector<1x16xf32>
    %c1_61 = arith.constant 1 : index
    %c48_62 = arith.constant 48 : index
    %137 = vector.load %arg9[%c1_61, %c48_62] : memref<2x384xf32, #tpu.memory_space<vmem>>, vector<1x16xf32>
    tpu.vector_store %arg9[%c1_61, %c48_62], %136 {strides = array<i32>} : memref<2x384xf32, #tpu.memory_space<vmem>>, vector<1x16xf32>,
    %138 = arith.index_cast %132 : i32 to index
    %139 = memref.load %arg5[%138] : memref<16xi32, #tpu.memory_space<smem>>
    %140 = arith.index_cast %139 : i32 to index
    %c0_63 = arith.constant 0 : index
    %141 = vector.load %arg8[%140, %c0_63] : memref<20x16xf32, #tpu.memory_space<vmem>>, vector<1x16xf32>
    %c1_64 = arith.constant 1 : index
    %c64_65 = arith.constant 64 : index
    %142 = vector.load %arg9[%c1_64, %c64_65] : memref<2x384xf32, #tpu.memory_space<vmem>>, vector<1x16xf32>
    tpu.vector_store %arg9[%c1_64, %c64_65], %141 {strides = array<i32>} : memref<2x384xf32, #tpu.memory_space<vmem>>, vector<1x16xf32>,
    %c8_i32_66 = arith.constant 8 : i32
    %143 = arith.muli %115, %c8_i32_66 : i32
    %c1_i32_67 = arith.constant 1 : i32
    %144 = arith.addi %143, %c1_i32_67 : i32
    %145 = arith.index_cast %144 : i32 to index
    %146 = memref.load %arg4[%145] : memref<16xi32, #tpu.memory_space<smem>>
    %147 = arith.index_cast %146 : i32 to index
    %c0_68 = arith.constant 0 : index
    %148 = vector.load %arg7[%147, %c0_68] : memref<50x16xf32, #tpu.memory_space<vmem>>, vector<1x16xf32>
    %c1_69 = arith.constant 1 : index
    %c80_70 = arith.constant 80 : index
    %149 = vector.load %arg9[%c1_69, %c80_70] : memref<2x384xf32, #tpu.memory_space<vmem>>, vector<1x16xf32>
    tpu.vector_store %arg9[%c1_69, %c80_70], %148 {strides = array<i32>} : memref<2x384xf32, #tpu.memory_space<vmem>>, vector<1x16xf32>,
    %150 = arith.index_cast %144 : i32 to index
    %151 = memref.load %arg5[%150] : memref<16xi32, #tpu.memory_space<smem>>
    %152 = arith.index_cast %151 : i32 to index
    %c0_71 = arith.constant 0 : index
    %153 = vector.load %arg8[%152, %c0_71] : memref<20x16xf32, #tpu.memory_space<vmem>>, vector<1x16xf32>
    %c1_72 = arith.constant 1 : index
    %c96_73 = arith.constant 96 : index
    %154 = vector.load %arg9[%c1_72, %c96_73] : memref<2x384xf32, #tpu.memory_space<vmem>>, vector<1x16xf32>
    tpu.vector_store %arg9[%c1_72, %c96_73], %153 {strides = array<i32>} : memref<2x384xf32, #tpu.memory_space<vmem>>, vector<1x16xf32>,
    %c8_i32_74 = arith.constant 8 : i32
    %155 = arith.muli %115, %c8_i32_74 : i32
    %c2_i32_75 = arith.constant 2 : i32
    %156 = arith.addi %155, %c2_i32_75 : i32
    %157 = arith.index_cast %156 : i32 to index
    %158 = memref.load %arg4[%157] : memref<16xi32, #tpu.memory_space<smem>>
    %159 = arith.index_cast %158 : i32 to index
    %c0_76 = arith.constant 0 : index
    %160 = vector.load %arg7[%159, %c0_76] : memref<50x16xf32, #tpu.memory_space<vmem>>, vector<1x16xf32>
    %c1_77 = arith.constant 1 : index
    %c112_78 = arith.constant 112 : index
    %161 = vector.load %arg9[%c1_77, %c112_78] : memref<2x384xf32, #tpu.memory_space<vmem>>, vector<1x16xf32>
    tpu.vector_store %arg9[%c1_77, %c112_78], %160 {strides = array<i32>} : memref<2x384xf32, #tpu.memory_space<vmem>>, vector<1x16xf32>,
    %162 = arith.index_cast %156 : i32 to index
    %163 = memref.load %arg5[%162] : memref<16xi32, #tpu.memory_space<smem>>
    %164 = arith.index_cast %163 : i32 to index
    %c0_79 = arith.constant 0 : index
    %165 = vector.load %arg8[%164, %c0_79] : memref<20x16xf32, #tpu.memory_space<vmem>>, vector<1x16xf32>
    %c1_80 = arith.constant 1 : index
    %c128_81 = arith.constant 128 : index
    %166 = vector.load %arg9[%c1_80, %c128_81] : memref<2x384xf32, #tpu.memory_space<vmem>>, vector<1x16xf32>
    tpu.vector_store %arg9[%c1_80, %c128_81], %165 {strides = array<i32>} : memref<2x384xf32, #tpu.memory_space<vmem>>, vector<1x16xf32>,
    %c8_i32_82 = arith.constant 8 : i32
    %167 = arith.muli %115, %c8_i32_82 : i32
    %c3_i32_83 = arith.constant 3 : i32
    %168 = arith.addi %167, %c3_i32_83 : i32
    %169 = arith.index_cast %168 : i32 to index
    %170 = memref.load %arg4[%169] : memref<16xi32, #tpu.memory_space<smem>>
    %171 = arith.index_cast %170 : i32 to index
    %c0_84 = arith.constant 0 : index
    %172 = vector.load %arg7[%171, %c0_84] : memref<50x16xf32, #tpu.memory_space<vmem>>, vector<1x16xf32>
    %c1_85 = arith.constant 1 : index
    %c144_86 = arith.constant 144 : index
    %173 = vector.load %arg9[%c1_85, %c144_86] : memref<2x384xf32, #tpu.memory_space<vmem>>, vector<1x16xf32>
    tpu.vector_store %arg9[%c1_85, %c144_86], %172 {strides = array<i32>} : memref<2x384xf32, #tpu.memory_space<vmem>>, vector<1x16xf32>,
    %174 = arith.index_cast %168 : i32 to index
    %175 = memref.load %arg5[%174] : memref<16xi32, #tpu.memory_space<smem>>
    %176 = arith.index_cast %175 : i32 to index
    %c0_87 = arith.constant 0 : index
    %177 = vector.load %arg8[%176, %c0_87] : memref<20x16xf32, #tpu.memory_space<vmem>>, vector<1x16xf32>
    %c1_88 = arith.constant 1 : index
    %c160_89 = arith.constant 160 : index
    %178 = vector.load %arg9[%c1_88, %c160_89] : memref<2x384xf32, #tpu.memory_space<vmem>>, vector<1x16xf32>
    tpu.vector_store %arg9[%c1_88, %c160_89], %177 {strides = array<i32>} : memref<2x384xf32, #tpu.memory_space<vmem>>, vector<1x16xf32>,
    %c8_i32_90 = arith.constant 8 : i32
    %179 = arith.muli %115, %c8_i32_90 : i32
    %c4_i32_91 = arith.constant 4 : i32
    %180 = arith.addi %179, %c4_i32_91 : i32
    %181 = arith.index_cast %180 : i32 to index
    %182 = memref.load %arg4[%181] : memref<16xi32, #tpu.memory_space<smem>>
    %183 = arith.index_cast %182 : i32 to index
    %c0_92 = arith.constant 0 : index
    %184 = vector.load %arg7[%183, %c0_92] : memref<50x16xf32, #tpu.memory_space<vmem>>, vector<1x16xf32>
    %c1_93 = arith.constant 1 : index
    %c176_94 = arith.constant 176 : index
    %185 = vector.load %arg9[%c1_93, %c176_94] : memref<2x384xf32, #tpu.memory_space<vmem>>, vector<1x16xf32>
    tpu.vector_store %arg9[%c1_93, %c176_94], %184 {strides = array<i32>} : memref<2x384xf32, #tpu.memory_space<vmem>>, vector<1x16xf32>,
    %186 = arith.index_cast %180 : i32 to index
    %187 = memref.load %arg5[%186] : memref<16xi32, #tpu.memory_space<smem>>
    %188 = arith.index_cast %187 : i32 to index
    %c0_95 = arith.constant 0 : index
    %189 = vector.load %arg8[%188, %c0_95] : memref<20x16xf32, #tpu.memory_space<vmem>>, vector<1x16xf32>
    %c1_96 = arith.constant 1 : index
    %c192_97 = arith.constant 192 : index
    %190 = vector.load %arg9[%c1_96, %c192_97] : memref<2x384xf32, #tpu.memory_space<vmem>>, vector<1x16xf32>
    tpu.vector_store %arg9[%c1_96, %c192_97], %189 {strides = array<i32>} : memref<2x384xf32, #tpu.memory_space<vmem>>, vector<1x16xf32>,
    %c8_i32_98 = arith.constant 8 : i32
    %191 = arith.muli %115, %c8_i32_98 : i32
    %c5_i32_99 = arith.constant 5 : i32
    %192 = arith.addi %191, %c5_i32_99 : i32
    %193 = arith.index_cast %192 : i32 to index
    %194 = memref.load %arg4[%193] : memref<16xi32, #tpu.memory_space<smem>>
    %195 = arith.index_cast %194 : i32 to index
    %c0_100 = arith.constant 0 : index
    %196 = vector.load %arg7[%195, %c0_100] : memref<50x16xf32, #tpu.memory_space<vmem>>, vector<1x16xf32>
    %c1_101 = arith.constant 1 : index
    %c208_102 = arith.constant 208 : index
    %197 = vector.load %arg9[%c1_101, %c208_102] : memref<2x384xf32, #tpu.memory_space<vmem>>, vector<1x16xf32>
    tpu.vector_store %arg9[%c1_101, %c208_102], %196 {strides = array<i32>} : memref<2x384xf32, #tpu.memory_space<vmem>>, vector<1x16xf32>,
    %198 = arith.index_cast %192 : i32 to index
    %199 = memref.load %arg5[%198] : memref<16xi32, #tpu.memory_space<smem>>
    %200 = arith.index_cast %199 : i32 to index
    %c0_103 = arith.constant 0 : index
    %201 = vector.load %arg8[%200, %c0_103] : memref<20x16xf32, #tpu.memory_space<vmem>>, vector<1x16xf32>
    %c1_104 = arith.constant 1 : index
    %c224_105 = arith.constant 224 : index
    %202 = vector.load %arg9[%c1_104, %c224_105] : memref<2x384xf32, #tpu.memory_space<vmem>>, vector<1x16xf32>
    tpu.vector_store %arg9[%c1_104, %c224_105], %201 {strides = array<i32>} : memref<2x384xf32, #tpu.memory_space<vmem>>, vector<1x16xf32>,
    %c8_i32_106 = arith.constant 8 : i32
    %203 = arith.muli %115, %c8_i32_106 : i32
    %c6_i32_107 = arith.constant 6 : i32
    %204 = arith.addi %203, %c6_i32_107 : i32
    %205 = arith.index_cast %204 : i32 to index
    %206 = memref.load %arg4[%205] : memref<16xi32, #tpu.memory_space<smem>>
    %207 = arith.index_cast %206 : i32 to index
    %c0_108 = arith.constant 0 : index
    %208 = vector.load %arg7[%207, %c0_108] : memref<50x16xf32, #tpu.memory_space<vmem>>, vector<1x16xf32>
    %c1_109 = arith.constant 1 : index
    %c240_110 = arith.constant 240 : index
    %209 = vector.load %arg9[%c1_109, %c240_110] : memref<2x384xf32, #tpu.memory_space<vmem>>, vector<1x16xf32>
    tpu.vector_store %arg9[%c1_109, %c240_110], %208 {strides = array<i32>} : memref<2x384xf32, #tpu.memory_space<vmem>>, vector<1x16xf32>,
    %210 = arith.index_cast %204 : i32 to index
    %211 = memref.load %arg5[%210] : memref<16xi32, #tpu.memory_space<smem>>
    %212 = arith.index_cast %211 : i32 to index
    %c0_111 = arith.constant 0 : index
    %213 = vector.load %arg8[%212, %c0_111] : memref<20x16xf32, #tpu.memory_space<vmem>>, vector<1x16xf32>
    %c1_112 = arith.constant 1 : index
    %c256_113 = arith.constant 256 : index
    %214 = vector.load %arg9[%c1_112, %c256_113] : memref<2x384xf32, #tpu.memory_space<vmem>>, vector<1x16xf32>
    tpu.vector_store %arg9[%c1_112, %c256_113], %213 {strides = array<i32>} : memref<2x384xf32, #tpu.memory_space<vmem>>, vector<1x16xf32>,
    %c8_i32_114 = arith.constant 8 : i32
    %215 = arith.muli %115, %c8_i32_114 : i32
    %c7_i32_115 = arith.constant 7 : i32
    %216 = arith.addi %215, %c7_i32_115 : i32
    %217 = arith.index_cast %216 : i32 to index
    %218 = memref.load %arg4[%217] : memref<16xi32, #tpu.memory_space<smem>>
    %219 = arith.index_cast %218 : i32 to index
    %c0_116 = arith.constant 0 : index
    %220 = vector.load %arg7[%219, %c0_116] : memref<50x16xf32, #tpu.memory_space<vmem>>, vector<1x16xf32>
    %c1_117 = arith.constant 1 : index
    %c272_118 = arith.constant 272 : index
    %221 = vector.load %arg9[%c1_117, %c272_118] : memref<2x384xf32, #tpu.memory_space<vmem>>, vector<1x16xf32>
    tpu.vector_store %arg9[%c1_117, %c272_118], %220 {strides = array<i32>} : memref<2x384xf32, #tpu.memory_space<vmem>>, vector<1x16xf32>,
    %222 = arith.index_cast %216 : i32 to index
    %223 = memref.load %arg5[%222] : memref<16xi32, #tpu.memory_space<smem>>
    %224 = arith.index_cast %223 : i32 to index
    %c0_119 = arith.constant 0 : index
    %225 = vector.load %arg8[%224, %c0_119] : memref<20x16xf32, #tpu.memory_space<vmem>>, vector<1x16xf32>
    %c1_120 = arith.constant 1 : index
    %c288_121 = arith.constant 288 : index
    %226 = vector.load %arg9[%c1_120, %c288_121] : memref<2x384xf32, #tpu.memory_space<vmem>>, vector<1x16xf32>
    tpu.vector_store %arg9[%c1_120, %c288_121], %225 {strides = array<i32>} : memref<2x384xf32, #tpu.memory_space<vmem>>, vector<1x16xf32>,
    return
  }
  func.func @transform_0(%arg0: i32, %arg1: memref<2xi32, #tpu.memory_space<smem>>, %arg2: memref<2xi32, #tpu.memory_space<smem>>, %arg3: memref<2xi32, #tpu.memory_space<smem>>, %arg4: memref<16xi32, #tpu.memory_space<smem>>, %arg5: memref<16xi32, #tpu.memory_space<smem>>) -> (i32, i32) {
    %c0_i32 = arith.constant 0 : i32
    %c0_i32_0 = arith.constant 0 : i32
    %c0_i32_1 = arith.constant 0 : i32
    return %c0_i32, %c0_i32_0 : i32, i32
  }
  func.func @transform_1(%arg0: i32, %arg1: memref<2xi32, #tpu.memory_space<smem>>, %arg2: memref<2xi32, #tpu.memory_space<smem>>, %arg3: memref<2xi32, #tpu.memory_space<smem>>, %arg4: memref<16xi32, #tpu.memory_space<smem>>, %arg5: memref<16xi32, #tpu.memory_space<smem>>) -> (i32, i32) {
    %c0_i32 = arith.constant 0 : i32
    %c0_i32_0 = arith.constant 0 : i32
    %c0_i32_1 = arith.constant 0 : i32
    return %c0_i32, %c0_i32_0 : i32, i32
  }
  func.func @transform_2(%arg0: i32, %arg1: memref<2xi32, #tpu.memory_space<smem>>, %arg2: memref<2xi32, #tpu.memory_space<smem>>, %arg3: memref<2xi32, #tpu.memory_space<smem>>, %arg4: memref<16xi32, #tpu.memory_space<smem>>, %arg5: memref<16xi32, #tpu.memory_space<smem>>) -> (i32, i32) {
    %c0_i32 = arith.constant 0 : i32
    %c0_i32_0 = arith.constant 0 : i32
    %c0_i32_1 = arith.constant 0 : i32
    return %c0_i32, %c0_i32_0 : i32, i32
  }
  func.func @transform_3(%arg0: i32, %arg1: memref<2xi32, #tpu.memory_space<smem>>, %arg2: memref<2xi32, #tpu.memory_space<smem>>, %arg3: memref<2xi32, #tpu.memory_space<smem>>, %arg4: memref<16xi32, #tpu.memory_space<smem>>, %arg5: memref<16xi32, #tpu.memory_space<smem>>) -> (i32, i32) {
    %c0_i32 = arith.constant 0 : i32
    %c0_i32_0 = arith.constant 0 : i32
    return %arg0, %c0_i32 : i32, i32
  }
}

</mosaic_0001>

<bundles_post_ra>
// kernel: tpu_custom_call.1
= control target key start
LH: loop header
LB: loop body
LE: loop exit
PB: predicated region body
PF: predicated region fallthrough
CT: control target
= control target key end

     0   :  { %s1056_s0 = inlined_call_operand.vmem [shape: s32[2], index: 0, kind: input, shape index: {}]   ;;  %s1057_s5 = inlined_call_operand.vmem [shape: f32[100,16], index: 5, kind: input, shape index: {}]   ;;  %s1058_s6 = inlined_call_operand.vmem [shape: f32[50,16], index: 6, kind: input, shape index: {}]   ;;  %s1059_s7 = inlined_call_operand.vmem [shape: f32[20,16], index: 7, kind: input, shape index: {}]   ;;  %s1060_s8 = inlined_call_operand.hbm [shape: f32[2,384], index: 8, kind: output, shape index: {}]   ;;  %s1061_s1 = inlined_call_operand.vmem [shape: s32[2], index: 1, kind: input, shape index: {}]   ;;  %s1062_s2 = inlined_call_operand.vmem [shape: s32[2], index: 2, kind: input, shape index: {}]   ;;  %s1063_s3 = inlined_call_operand.vmem [shape: s32[16], index: 3, kind: input, shape index: {}]   ;;  %s1064_s4 = inlined_call_operand.vmem [shape: s32[16], index: 4, kind: input, shape index: {}]  }
   0x1   :  { %s13_s29 = sshll.u32 %s1056_s0, 4  ;;  %s17_s10 = sshll.u32 %s1061_s1, 4  ;;  %s14_s29 = int_to_ptr.vmem [resolvable:$true] %s13_s29  ;;  %s18_s10 = int_to_ptr.vmem [resolvable:$true] %s17_s10 }
   0x2   :  { %s704_s11 = scalar_lea.vmem %s14_s29, 16  ;;  %p709_p1 = scmp.lt.s32.totalorder %s14_s29, %s14_s29 }
   0x3   :  { %p705_p0 = scmp.ne.s32.totalorder %s14_s29, %s704_s11  ;;  %p710_p2 = scmp.lt.s32.totalorder %s704_s11, %s704_s11 }
   0x5   :  { %p711_p3 = por %p710_p2, %p709_p1 }
   0x7   :  { %p712_p4 = pnand %p711_p3, %p705_p0 }
   0x9   :  { %715 = shalt.err (!%p712_p4)  }
   0xa   :  { %s790_s12 = smov [#allocation3]   ;;  %s716_s13 = scalar_lea.vmem %s18_s10, 16 }
   0xb   :  { %16 = dma.vmem_to_smem %s14_s29, 16, %s790_s12, [#allocation2] }
   0xc   :  { %p717_p5 = scmp.ne.s32.totalorder %s18_s10, %s716_s13  ;;  %p721_p6 = scmp.lt.s32.totalorder %s18_s10, %s18_s10 }
   0xd   :  { %p722_p7 = scmp.lt.s32.totalorder %s716_s13, %s716_s13 }
   0xf   :  { %p723_p8 = por %p722_p7, %p721_p6 }
  0x11   :  { %p724_p9 = pnand %p723_p8, %p717_p5 }
  0x13   :  { %727 = shalt.err (!%p724_p9)  }
  0x14   :  { %s791_s0 = smov [#allocation4]   ;;  %s21_s15 = sshll.u32 %s1062_s2, 4  ;;  %s22_s15 = int_to_ptr.vmem [resolvable:$true] %s21_s15 }
  0x15   :  { %20 = dma.vmem_to_smem %s18_s10, 16, %s791_s0, [#allocation2] }
  0x16   :  { %s25_s18 = sshll.u32 %s1063_s3, 4  ;;  %s728_s19 = scalar_lea.vmem %s22_s15, 16  ;;  %s26_s18 = int_to_ptr.vmem [resolvable:$true] %s25_s18 }
  0x17   :  { %p729_p10 = scmp.ne.s32.totalorder %s22_s15, %s728_s19  ;;  %p733_p11 = scmp.lt.s32.totalorder %s22_s15, %s22_s15 }
  0x18   :  { %p734_p12 = scmp.lt.s32.totalorder %s728_s19, %s728_s19 }
  0x1a   :  { %p735_p13 = por %p734_p12, %p733_p11 }
  0x1c   :  { %p736_p0 = pnand %p735_p13, %p729_p10 }
  0x1e   :  { %739 = shalt.err (!%p736_p0)  }
  0x1f   :  { %s792_s20 = smov [#allocation5]   ;;  %s740_s21 = scalar_lea.vmem %s26_s18, 16 }
  0x20   :  { %24 = dma.vmem_to_smem %s22_s15, 16, %s792_s20, [#allocation2] }
  0x21   :  { %p741_p1 = scmp.ne.s32.totalorder %s26_s18, %s740_s21  ;;  %p745_p2 = scmp.lt.s32.totalorder %s26_s18, %s26_s18 }
  0x22   :  { %p746_p3 = scmp.lt.s32.totalorder %s740_s21, %s740_s21 }
  0x24   :  { %p747_p4 = por %p746_p3, %p745_p2 }
  0x26   :  { %p748_p5 = pnand %p747_p4, %p741_p1 }
  0x28   :  { %751 = shalt.err (!%p748_p5)  }
  0x29   :  { %s793_s2 = smov [#allocation6]   ;;  %s29_s23 = sshll.u32 %s1064_s4, 4  ;;  %s30_s23 = int_to_ptr.vmem [resolvable:$true] %s29_s23 }
  0x2a   :  { %28 = dma.vmem_to_smem %s26_s18, 16, %s793_s2, [#allocation2] }
  0x2b   :  { %s752_s24 = scalar_lea.vmem %s30_s23, 16  ;;  %p757_p7 = scmp.lt.s32.totalorder %s30_s23, %s30_s23 }
  0x2c   :  { %p753_p6 = scmp.ne.s32.totalorder %s30_s23, %s752_s24  ;;  %p758_p8 = scmp.lt.s32.totalorder %s752_s24, %s752_s24 }
  0x2e   :  { %p759_p9 = por %p758_p8, %p757_p7 }
  0x30   :  { %p760_p10 = pnand %p759_p9, %p753_p6 }
  0x32   :  { %763 = shalt.err (!%p760_p10)  }
  0x33   :  { %s794_s25 = smov [#allocation7]  }
  0x34   :  { %32 = dma.vmem_to_smem %s30_s23, 16, %s794_s25, [#allocation2] }
  0x35   :  { %786 = dma.done.wait [#allocation2], 80 }
  0x36   :  { %787 = vsyncadd [#allocation2], 4294967216 }
  0x37   :  { %34 = sfence }
  0x38   :  { %s656_s26 = sld [smem:[#allocation4 + $0x1]]  ;;  %s49_s27 = sld [smem:[#allocation4]]  ;;  %v795_v0 = vmov 0.0  }
  0x39   :  { %s671_s28 = sld [smem:[#allocation6 + $0xb]]  ;;  %43 = vst [vmem:[#allocation8] sm:$0x3f] %v795_v0 }
  0x3a   :  { %s636_s29 = sld [smem:[#allocation6 + $0x3]] }
  0x3b   :  { %35 = vsyncpa [#allocation9], 0  ;;  %s638_s4 = sld [smem:[#allocation7 + $0x3]]  ;;  %s65_s30 = sld [smem:[#allocation5]]  ;;  %vm47_vm0 = vcmask 122880   ;;  %vm63_vm1 = vcmask 254080  }
  0x3c   :  { %s673_s9 = sld [smem:[#allocation7 + $0xb]]  ;;  %s658_s13 = sld [smem:[#allocation5 + $0x1]]  ;;  %vm79_vm2 = vcmask 385280   ;;  %vm96_vm3 = vcmask 516480   ;;  %vm112_vm4 = vcmask 647680   ;;  %vm129_vm5 = vcmask 778880  }
  0x3d   :  { %s796_s18 = smov 16   ;;  %s640_s23 = sld [smem:[#allocation6 + $0x4]]  ;;  %vm145_vm6 = vcmask 910080   ;;  %vm162_vm7 = vcmask 1041280  }
  0x3e   :  { %s318_s12 = scalar_lea.vmem %s1058_s6, %s656_s26  ;;  %s50_s14 = scalar_lea.vmem %s1058_s6, %s49_s27 }
  0x3f   :  { %v657_v1 = vld.sshfl [vmem:[%s318_s12] sm:$0x1 pattern:$0x76325410]  ;;  %s431_s17 = scalar_lea.vmem %s1058_s6, %s671_s28  ;;  %s82_s27 = sld [smem:[#allocation6]] }
  0x40   :  { %328 = vrot.lane.b32.xlu1 %v657_v1, %s796_s18  ;;  %v625_v2 = vld.sshfl [vmem:[%s50_s14] sm:$0x1 pattern:$0x76325410]  ;;  %s170_s21 = scalar_lea.vmem %s1058_s6, %s636_s29  ;;  %s675_s11 = sld [smem:[#allocation6 + $0xc]] }
  0x41   :  { %60 = vrot.lane.b32.xlu0 %v625_v2, %s796_s18  ;;  %v672_v3 = vld.sshfl [vmem:[%s431_s17] sm:$0x1 pattern:$0x76325410]  ;;  %s185_s22 = scalar_lea.vmem %s1059_s7, %s638_s4  ;;  %s66_s26 = scalar_lea.vmem %s1059_s7, %s65_s30 }
  0x42   :  { %v637_v4 = vld.sshfl [vmem:[%s170_s21] sm:$0x1 pattern:$0x76325410]  ;;  %s446_s10 = scalar_lea.vmem %s1059_s7, %s673_s9  ;;  %s333_s4 = scalar_lea.vmem %s1059_s7, %s658_s13 }
  0x43   :  { %v639_v5 = vld.sshfl [vmem:[%s185_s22] sm:$0x1 pattern:$0x76325410]  ;;  %s660_s1 = sld [smem:[#allocation6 + $0x8]]  ;;  %s797_s14 = smov 32  }
  0x44   :  { %441 = vrot.lane.b32.xlu1 %v672_v3, %s796_s18  ;;  %v626_v6 = vld.sshfl [vmem:[%s66_s26] sm:$0x1 pattern:$0x76325410]  ;;  %s201_s16 = scalar_lea.vmem %s1058_s6, %s640_s23  ;;  %s642_s17 = sld [smem:[#allocation7 + $0x4]] }
  0x45   :  { %180 = vrot.lane.b32.xlu0 %v637_v4, %s796_s18  ;;  %v674_v7 = vld.sshfl [vmem:[%s446_s10] sm:$0x1 pattern:$0x76325410]  ;;  %s83_s20 = scalar_lea.vmem %s1058_s6, %s82_s27  ;;  %s98_s21 = sld [smem:[#allocation7]] }
  0x46   :  { %v659_v8 = vld.sshfl [vmem:[%s333_s4] sm:$0x1 pattern:$0x76325410]  ;;  %s462_s3 = scalar_lea.vmem %s1058_s6, %s675_s11  ;;  %s677_s22 = sld [smem:[#allocation7 + $0xc]] }
  0x47   :  { %v641_v9 = vld.sshfl [vmem:[%s201_s16] sm:$0x1 pattern:$0x76325410]  ;;  %s662_s26 = sld [smem:[#allocation7 + $0x8]]  ;;  %s798_s28 = smov 48  }
  0x48   :  { %195 = vrot.lane.b32.xlu1 %v639_v5, %s797_s14  ;;  %v627_v10 = vld.sshfl [vmem:[%s83_s20] sm:$0x1 pattern:$0x76325410]  ;;  %s644_s27 = sld [smem:[#allocation6 + $0x5]]  ;;  %s629_s30 = sld [smem:[#allocation6 + $0x1]] }
  0x49   :  { %76 = vrot.lane.b32.xlu0 %v626_v6, %s797_s14  ;;  %s349_s23 = scalar_lea.vmem %s1058_s6, %s660_s1  ;;  %v676_v11 = vld.sshfl [vmem:[%s462_s3] sm:$0x1 pattern:$0x76325410]  ;;  %s914_s15 = sld [smem:[#allocation6 + $0xd]] }
  0x4a   :  { %v661_v12 = vld.sshfl [vmem:[%s349_s23] sm:$0x1 pattern:$0x76325410]  ;;  %s216_s12 = scalar_lea.vmem %s1059_s7, %s642_s17  ;;  %s919_s9 = sld [smem:[#allocation6 + $0x9]] }
  0x4b   :  { %s99_s11 = scalar_lea.vmem %s1059_s7, %s98_s21  ;;  %v643_v13 = vld.sshfl [vmem:[%s216_s12] sm:$0x1 pattern:$0x76325410]  ;;  %s799_s2 = smov 64  }
  0x4c   :  { %456 = vrot.lane.b32.xlu1 %v674_v7, %s797_s14  ;;  %v628_v14 = vld.sshfl [vmem:[%s99_s11] sm:$0x1 pattern:$0x76325410]  ;;  %s477_s19 = scalar_lea.vmem %s1059_s7, %s677_s22  ;;  %s924_s21 = sld [smem:[#allocation7 + $0x5]] }
  0x4d   :  { %343 = vrot.lane.b32.xlu0 %v659_v8, %s797_s14  ;;  %s364_s13 = scalar_lea.vmem %s1059_s7, %s662_s26  ;;  %v678_v15 = vld.sshfl [vmem:[%s477_s19] sm:$0x1 pattern:$0x76325410]  ;;  %s929_s23 = sld [smem:[#allocation7 + $0x1]] }
  0x4e   :  { %s232_s25 = scalar_lea.vmem %s1058_s6, %s644_s27  ;;  %v663_v16 = vld.sshfl [vmem:[%s364_s13] sm:$0x1 pattern:$0x76325410]  ;;  %s116_s29 = scalar_lea.vmem %s1058_s6, %s629_s30 }
  0x4f   :  { %s934_s10 = sld [smem:[#allocation7 + $0x9]]  ;;  %v645_v17 = vld.sshfl [vmem:[%s232_s25] sm:$0x1 pattern:$0x76325410]  ;;  %s493_s0 = scalar_lea.vmem %s1058_s6, %s914_s15 }
  0x50   :  { %211 = vrot.lane.b32.xlu1 %v641_v9, %s798_s28  ;;  %s655_s4 = sld [smem:[#allocation3 + $0x1]]  ;;  %s940_s11 = sld [smem:[#allocation6 + $0x7]]  ;;  %v630_v18 = vld.sshfl [vmem:[%s116_s29] sm:$0x1 pattern:$0x76325410] }
  0x51   :  { %93 = vrot.lane.b32.xlu0 %v627_v10, %s798_s28  ;;  %s44_s27 = sld [smem:[#allocation3]]  ;;  %s380_s30 = scalar_lea.vmem %s1058_s6, %s919_s9  ;;  %v680_v19 = vld.sshfl [vmem:[%s493_s0] sm:$0x1 pattern:$0x76325410] }
  0x52   :  { %s670_s19 = sld [smem:[#allocation7 + $0xa]]  ;;  %s946_s20 = sld [smem:[#allocation6 + $0xf]]  ;;  %v665_v20 = vld.sshfl [vmem:[%s380_s30] sm:$0x1 pattern:$0x76325410] }
  0x53   :  { %s948_s17 = sld [smem:[#allocation7 + $0x2]]  ;;  %s800_s13 = smov 80  }
  0x54   :  { %472 = vrot.lane.b32.xlu1 %v676_v11, %s798_s28  ;;  %s650_s24 = sld [smem:[#allocation7 + $0x6]]  ;;  %s954_s25 = sld [smem:[#allocation7 + $0xd]] }
  0x55   :  { %359 = vrot.lane.b32.xlu0 %v661_v12, %s798_s28  ;;  %s956_s22 = sld [smem:[#allocation7 + $0xe]]  ;;  %s132_s29 = scalar_lea.vmem %s1059_s7, %s929_s23 }
  0x56   :  { %s314_s0 = scalar_lea.vmem %s1057_s5, %s655_s4  ;;  %s968_s15 = sld [smem:[#allocation6 + $0x6]]  ;;  %v632_v24 = vld.sshfl [vmem:[%s132_s29] sm:$0x1 pattern:$0x76325410] }
  0x57   :  { %v315_v22 = vld [vmem:[%s314_s0] sm:$0x1]  ;;  %s45_s16 = scalar_lea.vmem %s1057_s5, %s44_s27  ;;  %s395_s9 = scalar_lea.vmem %s1059_s7, %s934_s10 }
  0x58   :  { %226 = vrot.lane.b32.xlu1 %v643_v13, %s799_s2  ;;  %316 = vst.msk [vmem:[#allocation8 + $0x1] sm:$0x1] %vm47_vm0, %v315_v22  ;;  %v46_v23 = vld [vmem:[%s45_s16] sm:$0x1]  ;;  %s426_s3 = scalar_lea.vmem %s1059_s7, %s670_s19  ;;  %s983_s26 = sld [smem:[#allocation6 + $0x2]] }
  0x59   :  { %109 = vrot.lane.b32.xlu0 %v628_v14, %s799_s2  ;;  %48 = vst.msk [vmem:[#allocation8] sm:$0x1] %vm47_vm0, %v46_v23  ;;  %v427_v25 = vld [vmem:[%s426_s3] sm:$0x1]  ;;  %s165_s28 = scalar_lea.vmem %s1059_s7, %s948_s17  ;;  %s283_s0 = scalar_lea.vmem %s1058_s6, %s940_s11 }
  0x5a   :  { %428 = vst.msk [vmem:[#allocation8 + $0x3] sm:$0x1] %vm47_vm0, %v427_v25  ;;  %v166_v26 = vld [vmem:[%s165_s28] sm:$0x1]  ;;  %s278_s29 = scalar_lea.vmem %s1059_s7, %s650_s24  ;;  %s801_s16 = smov 96  }
  0x5b   :  { %167 = vst.msk [vmem:[#allocation8 + $0x2] sm:$0x1] %vm47_vm0, %v166_v26  ;;  %v279_v27 = vld [vmem:[%s278_s29] sm:$0x1]  ;;  %s539_s1 = scalar_lea.vmem %s1059_s7, %s956_s22  ;;  %s544_s30 = scalar_lea.vmem %s1058_s6, %s946_s20 }
  0x5c   :  { %487 = vrot.lane.b32.xlu1 %v678_v15, %s799_s2  ;;  %280 = vst.msk [vmem:[#allocation8 + $0x4] sm:$0x1] %vm47_vm0, %v279_v27  ;;  %v540_v28 = vld [vmem:[%s539_s1] sm:$0x1]  ;;  %s668_s23 = sld [smem:[#allocation6 + $0xa]]  ;;  %s508_s22 = scalar_lea.vmem %s1059_s7, %s954_s25 }
  0x5d   :  { %374 = vrot.lane.b32.xlu0 %v663_v16, %s799_s2  ;;  %s247_s2 = scalar_lea.vmem %s1059_s7, %s924_s21  ;;  %v667_v29 = vld.sshfl [vmem:[%s395_s9] sm:$0x1 pattern:$0x76325410]  ;;  %541 = vst.msk [vmem:[#allocation8 + $0x5] sm:$0x1] %vm47_vm0, %v540_v28  ;;  %s263_s27 = scalar_lea.vmem %s1058_s6, %s968_s15 }
  0x5e   :  { %v647_v21 = vld.sshfl [vmem:[%s247_s2] sm:$0x1 pattern:$0x76325410]  ;;  %s653_s2 = sld [smem:[#allocation7 + $0x7]]  ;;  %s149_s20 = scalar_lea.vmem %s1058_s6, %s983_s26 }
  0x5f   :  { %v652_v30 = vld.sshfl [vmem:[%s283_s0] sm:$0x1 pattern:$0x76325410]  ;;  %s688_s28 = sld [smem:[#allocation7 + $0xf]]  ;;  %s683_s29 = sld [smem:[#allocation6 + $0xe]] }
  0x60   :  { %242 = vrot.lane.b32.xlu1 %v645_v17, %s800_s13  ;;  %v687_v31 = vld.sshfl [vmem:[%s544_s30] sm:$0x1 pattern:$0x76325410]  ;;  %s802_s15 = smov 112  }
  0x61   :  { %126 = vrot.lane.b32.xlu0 %v630_v18, %s800_s13  ;;  %v682_v32 = vld.sshfl [vmem:[%s508_s22] sm:$0x1 pattern:$0x76325410] }
  0x62   :  { %v649_v33 = vld.sshfl [vmem:[%s263_s27] sm:$0x1 pattern:$0x76325410]  ;;  %s411_s10 = scalar_lea.vmem %s1058_s6, %s668_s23 }
  0x63   :  { %v634_v34 = vld.sshfl [vmem:[%s149_s20] sm:$0x1 pattern:$0x76325410] }
  0x64   :  { %503 = vrot.lane.b32.xlu1 %v680_v19, %s800_s13  ;;  %s298_s17 = scalar_lea.vmem %s1059_s7, %s653_s2  ;;  %v669_v35 = vld.sshfl [vmem:[%s411_s10] sm:$0x1 pattern:$0x76325410] }
  0x65   :  { %390 = vrot.lane.b32.xlu0 %v665_v20, %s800_s13  ;;  %v654_v36 = vld.sshfl [vmem:[%s298_s17] sm:$0x1 pattern:$0x76325410]  ;;  %s524_s24 = scalar_lea.vmem %s1058_s6, %s683_s29  ;;  %s803_s6 = smov [#allocation8]  }
  0x66   :  { %v684_v38 = vld.sshfl [vmem:[%s524_s24] sm:$0x1 pattern:$0x76325410] }
  0x68   :  { %257 = vrot.lane.b32.xlu1 %v647_v21, %s801_s16 }
  0x69   :  { %142 = vrot.lane.b32.xlu0 %v632_v24, %s801_s16 }
  0x6c   :  { %405 = vrot.lane.b32.xlu1 %v667_v29, %s801_s16 }
  0x6d   :  { %293 = vrot.lane.b32.xlu0 %v652_v30, %s796_s18 }
  0x70   :  { %554 = vrot.lane.b32.xlu1 %v687_v31, %s796_s18  ;;  %s559_s18 = scalar_lea.vmem %s1059_s7, %s688_s28  ;;  %s579_s7 = sshll.u32 %s803_s6, 4  ;;  %s580_s7 = int_to_ptr.vmem [resolvable:$true] %s579_s7 }
  0x71   :  { %518 = vrot.lane.b32.xlu0 %v682_v32, %s801_s16  ;;  %v689_v37 = vld.sshfl [vmem:[%s559_s18] sm:$0x1 pattern:$0x76325410]  ;;  %p769_p12 = scmp.lt.s32.totalorder %s580_s7, %s580_s7 }
  0x74   :  { %273 = vrot.lane.b32.xlu1 %v649_v33, %s802_s15 }
  0x75   :  { %159 = vrot.lane.b32.xlu0 %v634_v34, %s802_s15 }
  0x78   :  { %421 = vrot.lane.b32.xlu1 %v669_v35, %s802_s15 }
  0x79   :  { %308 = vrot.lane.b32.xlu0 %v654_v36, %s797_s14 }
  0x7c   :  { %569 = vrot.lane.b32.xlu1 %v689_v37, %s797_s14  ;;  %s764_s14 = scalar_lea.vmem %s580_s7, 96 }
  0x7d   :  { %534 = vrot.lane.b32.xlu0 %v684_v38, %s802_s15  ;;  %p765_p11 = scmp.ne.s32.totalorder %s580_s7, %s764_s14  ;;  %p770_p13 = scmp.lt.s32.totalorder %s764_s14, %s764_s14 }
  0x7f   :  { %p771_p0 = por %p770_p13, %p769_p12 }
  0x81   :  { %p772_p1 = pnand %p771_p0, %p765_p11 }
  0xb2   :  { %v329_v39 = vpop.permute.xlu1 %328 }
  0xb3   :  { %331 = vst.msk [vmem:[#allocation8 + $0x1] sm:$0x1] %vm63_vm1, %v329_v39  ;;  %v61_v40 = vpop.permute.xlu0 %60 }
  0xb4   :  { %64 = vst.msk [vmem:[#allocation8] sm:$0x1] %vm63_vm1, %v61_v40 }
  0xb6   :  { %v442_v41 = vpop.permute.xlu1 %441 }
  0xb7   :  { %444 = vst.msk [vmem:[#allocation8 + $0x3] sm:$0x1] %vm63_vm1, %v442_v41  ;;  %v181_v42 = vpop.permute.xlu0 %180 }
  0xb8   :  { %183 = vst.msk [vmem:[#allocation8 + $0x2] sm:$0x1] %vm63_vm1, %v181_v42 }
  0xba   :  { %v196_v43 = vpop.permute.xlu1 %195 }
  0xbb   :  { %198 = vst.msk [vmem:[#allocation8 + $0x2] sm:$0x1] %vm79_vm2, %v196_v43  ;;  %v77_v44 = vpop.permute.xlu0 %76 }
  0xbc   :  { %80 = vst.msk [vmem:[#allocation8] sm:$0x1] %vm79_vm2, %v77_v44 }
  0xbe   :  { %v457_v45 = vpop.permute.xlu1 %456 }
  0xbf   :  { %459 = vst.msk [vmem:[#allocation8 + $0x3] sm:$0x1] %vm79_vm2, %v457_v45  ;;  %v344_v46 = vpop.permute.xlu0 %343 }
  0xc0   :  { %346 = vst.msk [vmem:[#allocation8 + $0x1] sm:$0x1] %vm79_vm2, %v344_v46 }
  0xc2   :  { %v212_v47 = vpop.permute.xlu1 %211 }
  0xc3   :  { %214 = vst.msk [vmem:[#allocation8 + $0x2] sm:$0x1] %vm96_vm3, %v212_v47  ;;  %v94_v48 = vpop.permute.xlu0 %93 }
  0xc4   :  { %97 = vst.msk [vmem:[#allocation8] sm:$0x1] %vm96_vm3, %v94_v48 }
  0xc6   :  { %v473_v49 = vpop.permute.xlu1 %472 }
  0xc7   :  { %475 = vst.msk [vmem:[#allocation8 + $0x3] sm:$0x1] %vm96_vm3, %v473_v49  ;;  %v360_v50 = vpop.permute.xlu0 %359 }
  0xc8   :  { %362 = vst.msk [vmem:[#allocation8 + $0x1] sm:$0x1] %vm96_vm3, %v360_v50 }
  0xca   :  { %v227_v51 = vpop.permute.xlu1 %226 }
  0xcb   :  { %229 = vst.msk [vmem:[#allocation8 + $0x2] sm:$0x1] %vm112_vm4, %v227_v51  ;;  %v110_v52 = vpop.permute.xlu0 %109 }
  0xcc   :  { %113 = vst.msk [vmem:[#allocation8] sm:$0x1] %vm112_vm4, %v110_v52 }
  0xce   :  { %v488_v53 = vpop.permute.xlu1 %487 }
  0xcf   :  { %490 = vst.msk [vmem:[#allocation8 + $0x3] sm:$0x1] %vm112_vm4, %v488_v53  ;;  %v375_v54 = vpop.permute.xlu0 %374 }
  0xd0   :  { %377 = vst.msk [vmem:[#allocation8 + $0x1] sm:$0x1] %vm112_vm4, %v375_v54 }
  0xd2   :  { %v243_v55 = vpop.permute.xlu1 %242 }
  0xd3   :  { %245 = vst.msk [vmem:[#allocation8 + $0x2] sm:$0x1] %vm129_vm5, %v243_v55  ;;  %v127_v56 = vpop.permute.xlu0 %126 }
  0xd4   :  { %130 = vst.msk [vmem:[#allocation8] sm:$0x1] %vm129_vm5, %v127_v56 }
  0xd6   :  { %v504_v57 = vpop.permute.xlu1 %503 }
  0xd7   :  { %506 = vst.msk [vmem:[#allocation8 + $0x3] sm:$0x1] %vm129_vm5, %v504_v57  ;;  %v391_v58 = vpop.permute.xlu0 %390 }
  0xd8   :  { %393 = vst.msk [vmem:[#allocation8 + $0x1] sm:$0x1] %vm129_vm5, %v391_v58 }
  0xda   :  { %v258_v59 = vpop.permute.xlu1 %257 }
  0xdb   :  { %260 = vst.msk [vmem:[#allocation8 + $0x2] sm:$0x1] %vm145_vm6, %v258_v59  ;;  %v143_v60 = vpop.permute.xlu0 %142 }
  0xdc   :  { %146 = vst.msk [vmem:[#allocation8] sm:$0x1] %vm145_vm6, %v143_v60 }
  0xde   :  { %v406_v61 = vpop.permute.xlu1 %405 }
  0xdf   :  { %408 = vst.msk [vmem:[#allocation8 + $0x1] sm:$0x1] %vm145_vm6, %v406_v61  ;;  %v294_v62 = vpop.permute.xlu0 %293 }
  0xe0   :  { %296 = vst.msk [vmem:[#allocation8 + $0x4] sm:$0x1] %vm63_vm1, %v294_v62 }
  0xe2   :  { %v555_v63 = vpop.permute.xlu1 %554 }
  0xe3   :  { %557 = vst.msk [vmem:[#allocation8 + $0x5] sm:$0x1] %vm63_vm1, %v555_v63  ;;  %v519_v0 = vpop.permute.xlu0 %518 }
  0xe4   :  { %521 = vst.msk [vmem:[#allocation8 + $0x3] sm:$0x1] %vm145_vm6, %v519_v0 }
  0xe6   :  { %v274_v1 = vpop.permute.xlu1 %273 }
  0xe7   :  { %276 = vst.msk [vmem:[#allocation8 + $0x2] sm:$0x1] %vm162_vm7, %v274_v1  ;;  %v160_v2 = vpop.permute.xlu0 %159 }
  0xe8   :  { %163 = vst.msk [vmem:[#allocation8] sm:$0x1] %vm162_vm7, %v160_v2 }
  0xea   :  { %v422_v3 = vpop.permute.xlu1 %421 }
  0xeb   :  { %424 = vst.msk [vmem:[#allocation8 + $0x1] sm:$0x1] %vm162_vm7, %v422_v3  ;;  %v309_v4 = vpop.permute.xlu0 %308 }
  0xec   :  { %311 = vst.msk [vmem:[#allocation8 + $0x4] sm:$0x1] %vm79_vm2, %v309_v4 }
  0xee   :  { %v570_v5 = vpop.permute.xlu1 %569 }
  0xef   :  { %572 = vst.msk [vmem:[#allocation8 + $0x5] sm:$0x1] %vm79_vm2, %v570_v5  ;;  %v535_v6 = vpop.permute.xlu0 %534 }
  0xf0   :  { %537 = vst.msk [vmem:[#allocation8 + $0x3] sm:$0x1] %vm162_vm7, %v535_v6 }
  0xf1   :  { %775 = shalt.err (!%p772_p1)
}
  0xf2   :  { %s776_s3 = scalar_lea.hbm %s1060_s8, 96 }
  0xf3   :  { %p777_p2 = scmp.ne.s32.totalorder %s1060_s8, %s776_s3  ;;  %p780_p3 = scmp.lt.u32.totalorder %s776_s3, %s1060_s8 }
  0xf5   :  { %p782_p4 = pnand %p780_p3, %p777_p2 }
  0xf7   :  { %785 = shalt.err (!%p782_p4)
}
  0xf8   :  { %582 = dma.vmem_to_hbm [thread:$0]  %s580_s7, 96, %s1060_s8, [#allocation9]  }
  0xf9   :  { %788 = dma.done.wait [#allocation9], 96  }
  0xfa   :  { %789 = vsyncadd [#allocation9], 4294967200 }
  0xfb   :  { %586 = vsyncpa [#allocation9], 1 }

</bundles_post_ra>
